<compile_context>
chip_gen: v6e
topology: v6e:2x2x1
jax: 0.10.0
libtpu: 0.0.40
codegen_flags: <defaults>
</compile_context>

<pallas_src>
import functools

import jax
import jax.numpy as jnp
from jax.experimental import pallas as pl
from jax.experimental.pallas import tpu as pltpu


def _round_up(a, m):
    return ((a + m - 1) // m) * m


# ---------------------------------------------------------------------------
# Pass 1: per-batch (and per reduction-split) KV = phi(K)^T V and Ksum.
# ---------------------------------------------------------------------------
def _kv_kernel(src_ref, wkv_ref, kv_ref, ksum_ref, *,
               compute_dtype, s_valid, tile_s, ns_per_split, need_row_mask):
    s = pl.program_id(2)

    @pl.when(s == 0)
    def _():
        kv_ref[...] = jnp.zeros_like(kv_ref)
        ksum_ref[...] = jnp.zeros_like(ksum_ref)

    C = kv_ref.shape[-1]
    src = src_ref[...]                                             # (tS, C) cdt
    # Fused K|V projection: one (tS, C) x (C, 2C) MXU matmul.
    proj = jnp.dot(src, wkv_ref[...], preferred_element_type=jnp.float32)
    k = proj[:, :C]
    v = proj[:, C:]

    # elu(k) + 1 feature map (f32 elementwise).
    kf = jnp.where(k > 0, k + 1.0, jnp.exp(k))
    if need_row_mask:
        # Zero out padded source rows so they do not pollute KV / Ksum.
        p = pl.program_id(1)
        row0 = (p * ns_per_split + s) * tile_s
        rows = row0 + jax.lax.broadcasted_iota(jnp.int32, (tile_s, 1), 0)
        kf = jnp.where(rows < s_valid, kf, 0.0)

    # KV += kf^T v without materializing a transpose: contract axis 0 of both.
    kv_ref[...] += jax.lax.dot_general(
        kf.astype(compute_dtype), v.astype(compute_dtype),
        dimension_numbers=(((0,), (0,)), ((), ())),
        preferred_element_type=jnp.float32)                        # (C, C)
    ksum_ref[...] += jnp.sum(kf, axis=0, keepdims=True)            # (1, C)


# ---------------------------------------------------------------------------
# Pass 2: per-L-tile attention readout + merge + LN1 + MLP + LN2 + residual.
# ---------------------------------------------------------------------------
def _attn_mlp_kernel(x_ref, kv_ref, ksum_ref, seg_ref, segT_ref,
                     wq_ref, wm_ref, w1a_ref, w1b_ref, w2_ref,
                     g1_ref, b1_ref, g2_ref, b2_ref,
                     o_ref, *, compute_dtype, approx_recip,
                     attn_eps=1e-6, ln_eps=1e-5):
    cdt = compute_dtype
    xc = x_ref[...].astype(cdt)                                    # (tL, C)

    # Q projection + feature map.
    q = jnp.dot(xc, wq_ref[...], preferred_element_type=jnp.float32)
    qf = jnp.where(q > 0, q + 1.0, jnp.exp(q))                     # f32
    qfc = qf.astype(cdt)

    # Numerator: KV is pre-masked (block-diagonal per head) and pre-cast.
    num = jnp.dot(qfc, kv_ref[...], preferred_element_type=jnp.float32)

    # Denominator: f32 per-head segment sum (tL,C)x(C,H), reciprocal, then a
    # tiny one-hot (H,C) matmul broadcasts it back to lane width.
    t = qf * ksum_ref[...]                                         # (tL, C) f32
    denom_h = jnp.dot(t, seg_ref[...],
                      preferred_element_type=jnp.float32) + attn_eps   # (tL, H)
    if approx_recip:
        z_h = pl.reciprocal(denom_h, approx=True)
    else:
        z_h = 1.0 / denom_h
    z = jnp.dot(z_h, segT_ref[...], preferred_element_type=jnp.float32)  # (tL, C)
    message = num * z

    # Merge projection.
    merged = jnp.dot(message.astype(cdt), wm_ref[...],
                     preferred_element_type=jnp.float32)

    # LayerNorm1 (f32 statistics).
    mu = jnp.mean(merged, axis=-1, keepdims=True)
    var = jnp.mean((merged - mu) ** 2, axis=-1, keepdims=True)
    msg = (merged - mu) * jax.lax.rsqrt(var + ln_eps)
    msg = msg * g1_ref[...] + b1_ref[...]

    # MLP on concat([x, msg]) without the concat: W1 split into x / msg halves.
    h1 = (jnp.dot(xc, w1a_ref[...], preferred_element_type=jnp.float32)
          + jnp.dot(msg.astype(cdt), w1b_ref[...],
                    preferred_element_type=jnp.float32))           # (tL, 2C)
    h1 = jnp.maximum(h1, 0.0)
    m2 = jnp.dot(h1.astype(cdt), w2_ref[...],
                 preferred_element_type=jnp.float32)               # (tL, C)

    # LayerNorm2 (f32 statistics).
    mu2 = jnp.mean(m2, axis=-1, keepdims=True)
    var2 = jnp.mean((m2 - mu2) ** 2, axis=-1, keepdims=True)
    m2 = (m2 - mu2) * jax.lax.rsqrt(var2 + ln_eps)
    m2 = m2 * g2_ref[...] + b2_ref[...]

    # Residual: re-read x here (shortens the (tL, C) f32 live range).
    o_ref[...] = (x_ref[...].astype(jnp.float32) + m2).astype(o_ref.dtype)


# ---------------------------------------------------------------------------
# Wrapper.
# ---------------------------------------------------------------------------
def loftr_encoder_layer(x, source, params, nhead, *,
                        compute_dtype=jnp.bfloat16,
                        block_l=1024, block_s=2048,
                        kv_splits=None,
                        vmem_limit_bytes=48 * 1024 * 1024):
    """x: [N, L, C], source: [N, S, C]. Returns [N, L, C].

    TODO(synk): user-supplied x_mask / source_mask (None in this spec) are not
    plumbed through; only internal tile-padding rows are masked.
    """
    N, L, C = x.shape
    S = source.shape[1]
    D = C // nhead
    cdt = compute_dtype
    wq, wk, wv, wm, w1, w2, g1, b1, g2, b2 = params

    # Weight prep: torch Linear stores [out, in]; kernels do x @ W^T.
    wqT = wq.T.astype(cdt)
    wkvT = jnp.concatenate([wk.T, wv.T], axis=1).astype(cdt)       # (C, 2C)
    wmT = wm.T.astype(cdt)
    w1T = w1.T                                                     # (2C, 2C)
    w1aT = w1T[:C].astype(cdt)                                     # x half
    w1bT = w1T[C:].astype(cdt)                                     # msg half
    w2T = w2.T.astype(cdt)                                         # (2C, C)
    g1r = g1.reshape(1, C).astype(jnp.float32)
    b1r = b1.reshape(1, C).astype(jnp.float32)
    g2r = g2.reshape(1, C).astype(jnp.float32)
    b2r = b2.reshape(1, C).astype(jnp.float32)

    # Head structure: block-diagonal mask (C,C) and one-hot segment matrices.
    head_ids = jnp.arange(C, dtype=jnp.int32) // D
    head_mask = (head_ids[:, None] == head_ids[None, :]).astype(jnp.float32)
    seg = (head_ids[:, None]
           == jnp.arange(nhead, dtype=jnp.int32)[None, :]).astype(jnp.float32)
    segT = seg.T                                                   # (H, C)

    # ---- Tiling: pad L / S up to tile multiples (no divisor search) --------
    block_l = max(8, (block_l // 8) * 8)
    block_s = max(8, (block_s // 8) * 8)

    if S <= block_s:
        tS, S_pad = S, S
    else:
        tS = block_s
        S_pad = _round_up(S, tS)
    nS = S_pad // tS

    # Split the S reduction so both v7x TensorCores have work when N is small.
    if kv_splits is None:
        P = 2 if (N == 1 and nS >= 2) else 1
    else:
        P = max(1, min(kv_splits, nS))
    if nS % P != 0:
        nS = _round_up(nS, P)
        S_pad = nS * tS
    nS_p = nS // P

    if L <= block_l:
        tL, L_pad = L, L
    else:
        tL = block_l
        L_pad = _round_up(L, tL)
    nL = L_pad // tL

    # bf16 source halves pass-1 HBM traffic; padded rows are masked in-kernel.
    src_c = source.astype(cdt)
    if S_pad != S:
        src_c = jnp.pad(src_c, ((0, 0), (0, S_pad - S), (0, 0)))
    x_pad = x if L_pad == L else jnp.pad(x, ((0, 0), (0, L_pad - L), (0, 0)))

    # ---- Pass 1: KV / Ksum (reduction over S tiles, optionally split) ------
    kv_p, ksum_p = pl.pallas_call(
        functools.partial(_kv_kernel, compute_dtype=cdt, s_valid=S,
                          tile_s=tS, ns_per_split=nS_p,
                          need_row_mask=(S_pad != S)),
        out_shape=(jax.ShapeDtypeStruct((N, P, C, C), jnp.float32),
                   jax.ShapeDtypeStruct((N, P, 1, C), jnp.float32)),
        grid_spec=pltpu.PrefetchScalarGridSpec(
            num_scalar_prefetch=0,
            grid=(N, P, nS_p),
            in_specs=[
                pl.BlockSpec((pl.Squeezed(), tS, C),
                             lambda b, p, s: (b, p * nS_p + s, 0)),
                pl.BlockSpec((C, 2 * C), lambda b, p, s: (0, 0)),   # Wk|Wv ^T
            ],
            out_specs=(
                pl.BlockSpec((pl.Squeezed(), pl.Squeezed(), C, C),
                             lambda b, p, s: (b, p, 0, 0)),
                pl.BlockSpec((pl.Squeezed(), pl.Squeezed(), 1, C),
                             lambda b, p, s: (b, p, 0, 0)),
            ),
        ),
        compiler_params=pltpu.CompilerParams(
            dimension_semantics=("parallel", "parallel", "arbitrary"),
            vmem_limit_bytes=vmem_limit_bytes),
    )(src_c, wkvT)

    # Combine split partials; apply the block-diagonal head mask exactly once
    # and hand pass 2 a pre-masked compute-dtype KV.  Ksum stays f32 so the
    # denominator segment sum keeps full precision.
    kv = (kv_p.sum(axis=1) * head_mask[None]).astype(cdt)          # (N, C, C)
    ksum = ksum_p.sum(axis=1)                                      # (N, 1, C)

    # ---- Pass 2: attention readout + merge + LN1 + MLP + LN2 + residual ----
    const2d = lambda shape: pl.BlockSpec(shape, lambda b, l: (0, 0))
    out = pl.pallas_call(
        functools.partial(_attn_mlp_kernel, compute_dtype=cdt,
                          approx_recip=(cdt != jnp.float32)),
        out_shape=jax.ShapeDtypeStruct((N, L_pad, C), x.dtype),
        grid_spec=pltpu.PrefetchScalarGridSpec(
            num_scalar_prefetch=0,
            grid=(N, nL),
            in_specs=[
                pl.BlockSpec((pl.Squeezed(), tL, C), lambda b, l: (b, l, 0)),  # x
                pl.BlockSpec((pl.Squeezed(), C, C), lambda b, l: (b, 0, 0)),   # KV
                pl.BlockSpec((pl.Squeezed(), 1, C), lambda b, l: (b, 0, 0)),   # Ksum
                const2d((C, nhead)),      # head one-hot  (C, H)
                const2d((nhead, C)),      # head one-hot^T (H, C)
                const2d((C, C)),          # Wq^T
                const2d((C, C)),          # Wmerge^T
                const2d((C, 2 * C)),      # W1^T (x half)
                const2d((C, 2 * C)),      # W1^T (msg half)
                const2d((2 * C, C)),      # W2^T
                const2d((1, C)),          # gamma1
                const2d((1, C)),          # beta1
                const2d((1, C)),          # gamma2
                const2d((1, C)),          # beta2
            ],
            out_specs=pl.BlockSpec((pl.Squeezed(), tL, C),
                                   lambda b, l: (b, l, 0)),
        ),
        compiler_params=pltpu.CompilerParams(
            dimension_semantics=("parallel", "parallel"),
            vmem_limit_bytes=vmem_limit_bytes),
    )(x_pad, kv, ksum, seg, segT, wqT, wmT, w1aT, w1bT, w2T,
      g1r, b1r, g2r, b2r)

    return out[:, :L] if L_pad != L else out


# ---------------------------------------------------------------------------
# Pure-JAX reference mirroring the PyTorch forward (f32).
# ---------------------------------------------------------------------------
def _reference(x, source, params, nhead, attn_eps=1e-6, ln_eps=1e-5):
    wq, wk, wv, wm, w1, w2, g1, b1, g2, b2 = params
    N, L, C = x.shape
    S = source.shape[1]
    D = C // nhead

    def feat(t):
        return jnp.where(t > 0, t + 1.0, jnp.exp(t))

    q = (x @ wq.T).reshape(N, L, nhead, D)
    k = (source @ wk.T).reshape(N, S, nhead, D)
    v = (source @ wv.T).reshape(N, S, nhead, D)
    Q, K = feat(q), feat(k)
    Vs = v / S
    KV = jnp.einsum("nshd,nshv->nhdv", K, Vs)
    Z = 1.0 / (jnp.einsum("nlhd,nhd->nlh", Q, K.sum(axis=1)) + attn_eps)
    msg = jnp.einsum("nlhd,nhdv,nlh->nlhv", Q, KV, Z) * S
    msg = msg.reshape(N, L, C) @ wm.T

    def ln(t, g, b):
        mu = jnp.mean(t, axis=-1, keepdims=True)
        var = jnp.mean((t - mu) ** 2, axis=-1, keepdims=True)
        return (t - mu) / jnp.sqrt(var + ln_eps) * g + b

    msg = ln(msg, g1, b1)
    cat = jnp.concatenate([x, msg], axis=-1)
    msg = jnp.maximum(cat @ w1.T, 0.0) @ w2.T
    msg = ln(msg, g2, b2)
    return x + msg


def _make_params(key, d_model):
    keys = jax.random.split(key, 10)
    scale = 0.1
    return (
        scale * jax.random.normal(keys[0], (d_model, d_model), jnp.float32),       # Wq
        scale * jax.random.normal(keys[1], (d_model, d_model), jnp.float32),       # Wk
        scale * jax.random.normal(keys[2], (d_model, d_model), jnp.float32),       # Wv
        scale * jax.random.normal(keys[3], (d_model, d_model), jnp.float32),       # Wmerge
        scale * jax.random.normal(keys[4], (2 * d_model, 2 * d_model), jnp.float32),  # W1
        scale * jax.random.normal(keys[5], (d_model, 2 * d_model), jnp.float32),      # W2
        1.0 + 0.05 * jax.random.normal(keys[6], (d_model,), jnp.float32),           # LN1 g
        0.05 * jax.random.normal(keys[7], (d_model,), jnp.float32),                 # LN1 b
        1.0 + 0.05 * jax.random.normal(keys[8], (d_model,), jnp.float32),           # LN2 g
        0.05 * jax.random.normal(keys[9], (d_model,), jnp.float32),                 # LN2 b
    )


if __name__ == "__main__":
    root = jax.random.PRNGKey(0)
    k_data, k_par, k_data2, k_par2 = jax.random.split(root, 4)

    # --- Test 1: small shapes, single tile per batch, default tiles ---------
    N, L, S, d_model, nhead = 2, 8, 8, 32, 4
    kx, ks = jax.random.split(k_data)
    x = jax.random.normal(kx, (N, L, d_model), jnp.float32)
    source = jax.random.normal(ks, (N, S, d_model), jnp.float32)
    params = _make_params(k_par, d_model)

    ref = _reference(x, source, params, nhead)

    out_f32 = jax.block_until_ready(
        loftr_encoder_layer(x, source, params, nhead,
                            compute_dtype=jnp.float32))
    assert out_f32.shape == (N, L, d_model)
    assert jnp.allclose(out_f32, ref, atol=1e-3, rtol=1e-3), "f32 path mismatch"

    out_bf16 = jax.block_until_ready(
        loftr_encoder_layer(x, source, params, nhead,
                            compute_dtype=jnp.bfloat16))
    assert jnp.allclose(out_bf16, ref, atol=3e-2, rtol=3e-2), "bf16 path mismatch"

    # --- Test 2: multi-tile, non-multiple L/S (padding + mask), KV split ----
    N2, L2, S2, C2, H2 = 1, 40, 48, 32, 4
    kx2, ks2 = jax.random.split(k_data2)
    x2 = jax.random.normal(kx2, (N2, L2, C2), jnp.float32)
    src2 = jax.random.normal(ks2, (N2, S2, C2), jnp.float32)
    params2 = _make_params(k_par2, C2)

    ref2 = _reference(x2, src2, params2, H2)
    out2 = jax.block_until_ready(
        loftr_encoder_layer(x2, src2, params2, H2, compute_dtype=jnp.float32,
                            block_l=16, block_s=16))
    assert out2.shape == (N2, L2, C2)
    assert jnp.allclose(out2, ref2, atol=1e-3, rtol=1e-3), "tiled/padded path mismatch"

    print("KERNEL_OK")
</pallas_src>

<mosaic_0001>
module attributes {stable_mosaic.version = 11 : i64} {
  func.func @_kv_kernel(%arg0: i32, %arg1: i32, %arg2: i32, %arg3: memref<1x8x32xf32, #tpu.memory_space<vmem>>, %arg4: memref<32x64xf32, #tpu.memory_space<vmem>>, %arg5: memref<1x1x32x32xf32, #tpu.memory_space<vmem>>, %arg6: memref<1x1x1x32xf32, #tpu.memory_space<vmem>>) attributes {dimension_semantics = [#tpu.dimension_semantics<parallel>, #tpu.dimension_semantics<parallel>, #tpu.dimension_semantics<arbitrary>], iteration_bounds = array<i64: 2, 1, 1>, scalar_prefetch = 0 : i64, scratch_operands = 0 : i64, tpu.core_type = #tpu.core_type<tc>, window_params = [{transform_indices = @transform_0, window_bounds = array<i64: 1, 8, 32>}, {pipeline_mode = #tpu.pipeline_mode<synchronous>, transform_indices = @transform_1, window_bounds = array<i64: 32, 64>}, {transform_indices = @transform_2, window_bounds = array<i64: 1, 1, 32, 32>}, {transform_indices = @transform_3, window_bounds = array<i64: 1, 1, 1, 32>}]} {
    %c0_i32 = arith.constant 0 : i32
    %0 = arith.cmpi eq, %arg2, %c0_i32 : i32
    %1 = arith.extui %0 : i1 to i32
    %c0_i32_0 = arith.constant 0 : i32
    %2 = arith.cmpi ne, %1, %c0_i32_0 : i32
    scf.if %2 {
      %cst_25 = arith.constant 0.000000e+00 : f32
      %30 = vector.broadcast %cst_25 : f32 to vector<32x32xf32>
      %c0_26 = arith.constant 0 : index
      %c0_27 = arith.constant 0 : index
      %c0_28 = arith.constant 0 : index
      %c0_29 = arith.constant 0 : index
      %31 = vector.load %arg5[%c0_26, %c0_27, %c0_28, %c0_29] : memref<1x1x32x32xf32, #tpu.memory_space<vmem>>, vector<1x1x32x32xf32>
      %32 = vector.shape_cast %31 : vector<1x1x32x32xf32> to vector<32x32xf32>
      %33 = vector.shape_cast %30 : vector<32x32xf32> to vector<1x1x32x32xf32>
      tpu.vector_store %arg5[%c0_26, %c0_27, %c0_28, %c0_29], %33 {strides = array<i32>} : memref<1x1x32x32xf32, #tpu.memory_space<vmem>>, vector<1x1x32x32xf32>,
      %cst_30 = arith.constant 0.000000e+00 : f32
      %34 = vector.broadcast %cst_30 : f32 to vector<1x32xf32>
      %c0_31 = arith.constant 0 : index
      %c0_32 = arith.constant 0 : index
      %c0_33 = arith.constant 0 : index
      %c0_34 = arith.constant 0 : index
      %35 = vector.load %arg6[%c0_31, %c0_32, %c0_33, %c0_34] : memref<1x1x1x32xf32, #tpu.memory_space<vmem>>, vector<1x1x1x32xf32>
      %36 = vector.shape_cast %35 : vector<1x1x1x32xf32> to vector<1x32xf32>
      %37 = vector.shape_cast %34 : vector<1x32xf32> to vector<1x1x1x32xf32>
      tpu.vector_store %arg6[%c0_31, %c0_32, %c0_33, %c0_34], %37 {strides = array<i32>} : memref<1x1x1x32xf32, #tpu.memory_space<vmem>>, vector<1x1x1x32xf32>,
    } else {
    }
    %c0 = arith.constant 0 : index
    %c0_1 = arith.constant 0 : index
    %c0_2 = arith.constant 0 : index
    %3 = vector.load %arg3[%c0, %c0_1, %c0_2] : memref<1x8x32xf32, #tpu.memory_space<vmem>>, vector<1x8x32xf32>
    %4 = vector.shape_cast %3 : vector<1x8x32xf32> to vector<8x32xf32>
    %c0_3 = arith.constant 0 : index
    %c0_4 = arith.constant 0 : index
    %5 = vector.load %arg4[%c0_3, %c0_4] : memref<32x64xf32, #tpu.memory_space<vmem>>, vector<32x64xf32>
    %cst = arith.constant dense<0.000000e+00> : vector<8x64xf32>
    %6 = tpu.matmul %4, %5, %cst {dimension_numbers = #tpu.dot_dimension_numbers<[1], [0], [0], [1], [0, 0, 1, 1], [], []>} : vector<8x32xf32>, vector<32x64xf32>, vector<8x64xf32> -> vector<8x64xf32>
    %7 = vector.extract_strided_slice %6 {offsets = [0, 0], sizes = [8, 32], strides = [1, 1]} : vector<8x64xf32> to vector<8x32xf32>
    %8 = vector.extract_strided_slice %6 {offsets = [0, 32], sizes = [8, 32], strides = [1, 1]} : vector<8x64xf32> to vector<8x32xf32>
    %cst_5 = arith.constant 0.000000e+00 : f32
    %9 = vector.broadcast %cst_5 : f32 to vector<8x32xf32>
    %10 = arith.cmpf ogt, %7, %9 : vector<8x32xf32>
    %cst_6 = arith.constant 1.000000e+00 : f32
    %11 = vector.broadcast %cst_6 : f32 to vector<8x32xf32>
    %12 = arith.addf %7, %11 : vector<8x32xf32>
    %13 = math.exp %7 : vector<8x32xf32>
    %14 = arith.select %10, %12, %13 : vector<8x32xi1>, vector<8x32xf32>
    %c0_7 = arith.constant 0 : index
    %c0_8 = arith.constant 0 : index
    %c0_9 = arith.constant 0 : index
    %c0_10 = arith.constant 0 : index
    %15 = vector.load %arg5[%c0_7, %c0_8, %c0_9, %c0_10] : memref<1x1x32x32xf32, #tpu.memory_space<vmem>>, vector<1x1x32x32xf32>
    %16 = vector.shape_cast %15 : vector<1x1x32x32xf32> to vector<32x32xf32>
    %cst_11 = arith.constant dense<0.000000e+00> : vector<32x32xf32>
    %17 = tpu.matmul %14, %8, %cst_11 {dimension_numbers = #tpu.dot_dimension_numbers<[0], [0], [1], [1], [0, 1, 1, 1], [], []>} : vector<8x32xf32>, vector<8x32xf32>, vector<32x32xf32> -> vector<32x32xf32>
    %18 = arith.addf %16, %17 : vector<32x32xf32>
    %c0_12 = arith.constant 0 : index
    %c0_13 = arith.constant 0 : index
    %c0_14 = arith.constant 0 : index
    %c0_15 = arith.constant 0 : index
    %19 = vector.load %arg5[%c0_12, %c0_13, %c0_14, %c0_15] : memref<1x1x32x32xf32, #tpu.memory_space<vmem>>, vector<1x1x32x32xf32>
    %20 = vector.shape_cast %19 : vector<1x1x32x32xf32> to vector<32x32xf32>
    %21 = vector.shape_cast %18 : vector<32x32xf32> to vector<1x1x32x32xf32>
    tpu.vector_store %arg5[%c0_12, %c0_13, %c0_14, %c0_15], %21 {strides = array<i32>} : memref<1x1x32x32xf32, #tpu.memory_space<vmem>>, vector<1x1x32x32xf32>,
    %c0_16 = arith.constant 0 : index
    %c0_17 = arith.constant 0 : index
    %c0_18 = arith.constant 0 : index
    %c0_19 = arith.constant 0 : index
    %22 = vector.load %arg6[%c0_16, %c0_17, %c0_18, %c0_19] : memref<1x1x1x32xf32, #tpu.memory_space<vmem>>, vector<1x1x1x32xf32>
    %23 = vector.shape_cast %22 : vector<1x1x1x32xf32> to vector<1x32xf32>
    %cst_20 = arith.constant dense<0.000000e+00> : vector<32xf32>
    %24 = vector.multi_reduction <add>, %14, %cst_20 [0] : vector<8x32xf32> to vector<32xf32>
    %25 = vector.shape_cast %24 : vector<32xf32> to vector<1x32xf32>
    %26 = arith.addf %23, %25 : vector<1x32xf32>
    %c0_21 = arith.constant 0 : index
    %c0_22 = arith.constant 0 : index
    %c0_23 = arith.constant 0 : index
    %c0_24 = arith.constant 0 : index
    %27 = vector.load %arg6[%c0_21, %c0_22, %c0_23, %c0_24] : memref<1x1x1x32xf32, #tpu.memory_space<vmem>>, vector<1x1x1x32xf32>
    %28 = vector.shape_cast %27 : vector<1x1x1x32xf32> to vector<1x32xf32>
    %29 = vector.shape_cast %26 : vector<1x32xf32> to vector<1x1x1x32xf32>
    tpu.vector_store %arg6[%c0_21, %c0_22, %c0_23, %c0_24], %29 {strides = array<i32>} : memref<1x1x1x32xf32, #tpu.memory_space<vmem>>, vector<1x1x1x32xf32>,
    return
  }
  func.func @transform_0(%arg0: i32, %arg1: i32, %arg2: i32) -> (i32, i32, i32) {
    %c1_i32 = arith.constant 1 : i32
    %0 = arith.muli %arg1, %c1_i32 : i32
    %1 = arith.addi %0, %arg2 : i32
    %c0_i32 = arith.constant 0 : i32
    %c0_i32_0 = arith.constant 0 : i32
    return %arg0, %1, %c0_i32 : i32, i32, i32
  }
  func.func @transform_1(%arg0: i32, %arg1: i32, %arg2: i32) -> (i32, i32) {
    %c0_i32 = arith.constant 0 : i32
    %c0_i32_0 = arith.constant 0 : i32
    %c0_i32_1 = arith.constant 0 : i32
    return %c0_i32, %c0_i32_0 : i32, i32
  }
  func.func @transform_2(%arg0: i32, %arg1: i32, %arg2: i32) -> (i32, i32, i32, i32) {
    %c0_i32 = arith.constant 0 : i32
    %c0_i32_0 = arith.constant 0 : i32
    %c0_i32_1 = arith.constant 0 : i32
    return %arg0, %arg1, %c0_i32, %c0_i32_0 : i32, i32, i32, i32
  }
  func.func @transform_3(%arg0: i32, %arg1: i32, %arg2: i32) -> (i32, i32, i32, i32) {
    %c0_i32 = arith.constant 0 : i32
    %c0_i32_0 = arith.constant 0 : i32
    %c0_i32_1 = arith.constant 0 : i32
    return %arg0, %arg1, %c0_i32, %c0_i32_0 : i32, i32, i32, i32
  }
}

</mosaic_0001>

<bundles_post_ra>
// kernel: tpu_custom_call.1
= control target key start
LH: loop header
LB: loop body
LE: loop exit
PB: predicated region body
PF: predicated region fallthrough
CT: control target
= control target key end

     0   :  { %9 = vsyncpa [#allocation3], 0  ;;  %s1228_s0 = inlined_call_operand.hbm [shape: f32[2,8,32], index: 0, kind: input, shape index: {}]   ;;  %s1229_s1 = inlined_call_operand.hbm [shape: f32[32,64], index: 1, kind: input, shape index: {}]   ;;  %s1230_s2 = inlined_call_operand.hbm [shape: f32[2,1,32,32], index: 2, kind: output, shape index: {0}]   ;;  %s1231_s3 = inlined_call_operand.hbm [shape: f32[2,1,1,32], index: 3, kind: output, shape index: {1}]  }
   0x1   :  { %11 = vsyncpa [#allocation3 + $0x1], 0 }
   0x2   :  { %12 = vsyncpa [#allocation6], 0 }
   0x3   :  { %13 = vsyncpa [#allocation4], 0 }
   0x4   :  { %15 = vsyncpa [#allocation4 + $0x1], 0 }
   0x5   :  { %16 = vsyncpa [#allocation9], 0 }
   0x6   :  { %18 = vsyncpa [#allocation9 + $0x1], 0  ;;  %s995_s12 = smov 0   ;;  %s997_s13 = smov 0  }
   0x7   :  { %s999_s14 = smov 0   ;;  %s1001_s15 = smov 0  }
   0x8   :  { %s1003_s16 = smov 0   ;;  %s1005_s17 = smov 0  }
   0x9 LB: > { %s655_s18 = sadd.s32 4294967295, %s962_s17   ;;  %s656_s19 = sadd.s32 4294967294, %s962_s17   ;;  %s962_s17 = sphi %s1005_s17, %s24_s17   ;;  %s958_s16 = sphi %s1003_s16, %s1249_s16   ;;  %s954_s15 = sphi %s1001_s15, %s1248_s15   ;;  %s950_s14 = sphi %s999_s14, %s1247_s14   ;;  %s946_s13 = sphi %s997_s13, %s1246_s13   ;;  %s942_s12 = sphi %s995_s12, %s1245_s12  }
   0xa   : > { %p67_p0 = scmp.ne.s32.totalorder %s946_s13, %s942_s12  ;;  %p1029_p1 = scmp.eq.s32.totalorder %s655_s18, 0 }
   0xb   : > { %p1033_p2 = scmp.eq.s32.totalorder %s655_s18, 1  ;;  %p120_p3 = scmp.eq.s32.totalorder %s656_s19, 1 }
   0xc   : > { %p1039_p4 = por %p1029_p1, %p67_p0  ;;  %p657_p5 = scmp.ge.s32.totalorder %s962_s17, 1 }
   0xd   : > { %p1044_p6 = por %p120_p3, %p67_p0  ;;  %p155_p7 = scmp.lt.s32.totalorder %s962_s17, 3 }
   0xe   : > { %s1235_s22 = scalar_select %p1039_p4, 1, 0 }
   0xf   : > { %s1236_s23 = scalar_select %p1044_p6, 1, 0 }
  0x10   : > { %p1049_p8 = pnand %p657_p5, %p155_p7  ;;  %s964_s25 = smov [#allocation5]  }
  0x11   : > { %s167_s26 = sshll.u32 %s964_s25, 4  ;;  %s43_s28 = sadd.s32 1, %s958_s16  ;;  %s168_s26 = int_to_ptr.vmem [resolvable:$true] %s167_s26 }
  0x12   : > { %p717_p9 = pneg %p1049_p8  ;;  %s805_s29 = scalar_lea.vmem %s168_s26, 512 }
  0x13   : > { %p806_p13 = scmp.ne.s32.totalorder %s168_s26, %s805_s29  ;;  %p813_p5 = scmp.lt.s32.totalorder %s168_s26, %s168_s26 }
  0x14   : > { %p1058_p11 = pnand %p717_p9, %p1029_p1  ;;  %p814_p7 = scmp.lt.s32.totalorder %s805_s29, %s805_s29 }
  0x16   : > { %p796_p12 = pneg %p1058_p11  ;;  %p815_p6 = por %p814_p7, %p813_p5 }
  0x18   : > { %p808_p0 = pnand %p806_p13, %p796_p12 }
  0x1a   : > { %p809_p3 = pneg %p808_p0 }
  0x1c   : > { %p816_p4 = pnand %p815_p6, %p809_p3 }
  0x1e   : > { %819 = shalt.err (!%p816_p4)
}
  0x1f   : > { %s965_s30 = smov 128   ;;  %s966_s4 = smov 8  }
  0x20   : > { %720 = dma.hbm_to_vmem [thread:$0]  (!%p1058_p11), %s1229_s1, 512, %s168_s26, [#allocation6], %s965_s30, %s965_s30, %s966_s4  }
  0x21   : > { %p45_p6 = scmp.ge.s32.totalorder %s43_s28, 2  ;;  %s54_s7 = sadd.s32 1, %s950_s14 }
  0x22   : > { %p61_p4 = scmp.ne.s32.totalorder %s950_s14, %s946_s13  ;;  %p62_p9 = scmp.eq.s32.totalorder %s962_s17, 0 }
  0x23   : > { %s1251_s28 = smov (%p45_p6, %s43_s28), 0  ;;  %p733_p0 = scmp.lt.s32.totalorder %s962_s17, 2 }
  0x24   : > { %p1076_p12 = por %p62_p9, %p61_p4  ;;  %p1082_p13 = por %p1033_p2, %p61_p4 }
  0x25   : > { %s49_s10 = ssub.s32 %s958_s16, %s1251_s28  ;;  %s181_s11 = sand.u32 1, %s950_s14  }
  0x26   : > { %p52_p11 = scmp.eq.s32.totalorder %s49_s10, 0  ;;  %s660_s18 = sshll.u32 %s181_s11, 3 }
  0x27   : > { %s661_s25 = sshll.u32 %s958_s16, 7  ;;  %s185_s30 = scalar_lea.vmem [#allocation2], %s660_s18 }
  0x28   : > { %s1091_s19 = scalar_select %p52_p11, %s950_s14, %s54_s7  }
  0x29   : > { %s192_s29 = scalar_lea.hbm %s1228_s0, %s661_s25  ;;  %s194_s4 = sshll.u32 %s185_s30, 4  ;;  %s195_s4 = int_to_ptr.vmem [resolvable:$true] %s194_s4 }
  0x2a   : > { %p1099_p2 = pnand %p733_p0, %p1076_p12  ;;  %s182_s5 = scalar_lea.sflag [#allocation3], %s181_s11 }
  0x2b   : > { %s833_s6 = scalar_lea.vmem %s195_s4, 128  ;;  %s967_s7 = smov [#allocation2]  }
  0x2c   : > { %p822_p3 = pneg %p1099_p2  ;;  %p834_p5 = scmp.ne.s32.totalorder %s195_s4, %s833_s6 }
  0x2d   : > { %s838_s10 = sshll.u32 %s967_s7, 4  ;;  %s839_s10 = int_to_ptr.vmem [resolvable:$false] %s838_s10 }
  0x2e   : > { %p836_p7 = pnand %p834_p5, %p822_p3  ;;  %s840_s25 = scalar_lea.vmem %s839_s10, 256 }
  0x2f   : > { %p841_p4 = scmp.lt.s32.totalorder %s195_s4, %s839_s10  ;;  %p842_p9 = scmp.lt.s32.totalorder %s840_s25, %s833_s6 }
  0x30   : > { %p837_p6 = pneg %p836_p7 }
  0x31   : > { %p843_p11 = por %p842_p9, %p841_p4 }
  0x33   : > { %p844_p10 = pnand %p843_p11, %p837_p6 }
  0x35   : > { %847 = shalt.err (!%p844_p10)
}
  0x36   : > { %724 = dma.hbm_to_vmem [thread:$0]  (!%p1099_p2), %s192_s29, 128, %s195_s4, %s182_s5  }
  0x37   : > { %203 = sbr.rel (%p1049_p8) target bundleno = 643 (0x283), region = 28  ;;  %s1110_s8 = sand.u32 (!%p1049_p8), 1, %s946_s13  }
  0x38   : > { %s663_s11 = sshll.u32 (!%p1049_p8), %s1110_s8, 3  ;;  %s206_s18 = scalar_lea.sflag (!%p1049_p8), [#allocation3], %s1110_s8 }
  0x39   : > { %s209_s26 = scalar_lea.vmem (!%p1049_p8), [#allocation2], %s663_s11  ;;  %p1242_p12 = scmp.ne.s32.totalorder (!%p1049_p8), %s1235_s22, 0 }
  0x3c   : > { %925 = dma.done.wait (%p1242_p12), %s206_s18, 128  }
  0x3d   : > { %927 = vsyncadd (%p1242_p12), %s206_s18, 4294967168 }
  0x3e   : > { %929 = dma.done.wait (%p1029_p1), [#allocation6], 512  }
  0x3f   : > { %931 = vsyncadd (%p1029_p1), [#allocation6], 4294966784  ;;  %v968_v0 = vmov 0.0   ;;  %vm969_vm0 = vmmov 0   ;;  %v256_v1 = vld [vmem:[#allocation5 + $0x18] sm:$0xff]  ;;  %v255_v2 = vld [vmem:[#allocation5 + $0x10] sm:$0xff] }
  0x40   : > { %688 = vmatprep.subr.mxu0 %v968_v0  ;;  %696 = vmatprep.mubr.msk.f32.mxu0 %vm969_vm0, %v968_v0  ;;  %v254_v3 = vld [vmem:[#allocation5 + $0x8] sm:$0xff]  ;;  %v253_v4 = vld [vmem:[#allocation5] sm:$0xff]  ;;  %vm245_vm1 = vcmask 261120   ;;  %v252_v5 = vld [vmem:[%s209_s26] sm:$0xff]  ;;  %vm250_vm2 = vcmask 253952   ;;  %s1124_s20 = scalar_lea.vmem [#allocation8], %s1110_s8 }
  0x41   : > { %689 = vmatpush3.msra.mxu0 %v256_v1  ;;  %251 = vst.msk [vmem:[%s1124_s20] sm:$0x1] %vm250_vm2, %v968_v0  ;;  %s970_s22 = smov 96   ;;  %s665_s24 = sshll.u32 %s1110_s8, 5  ;;  %vm376_vm4 = vcmask 64512  }
  0x42   : > { %690 = vmatprep.subr.mxu0 %v968_v0  ;;  %s1133_s27 = scalar_lea.vmem [#allocation7], %s665_s24  ;;  %s674_s29 = sshll.u32 %s954_s15, 4 }
  0x43   : > { %691 = vmatpush3.msra.mxu0 %v255_v2  ;;  %247 = vst.msk [vmem:[%s1133_s27 + $0x8] sm:$0xff] %vm245_vm1, %v968_v0  ;;  %246 = vst.msk [vmem:[%s1133_s27] sm:$0xff] %vm245_vm1, %v968_v0  ;;  %s530_s30 = sshll.u32 %s1124_s20, 4  ;;  %s528_s5 = scalar_lea.hbm %s1231_s3, %s674_s29  ;;  %s531_s30 = int_to_ptr.vmem [resolvable:$true] %s530_s30 }
  0x44   : > { %692 = vmatprep.subr.mxu0 %v968_v0  ;;  %248 = vst.msk [vmem:[%s1133_s27 + $0x10] sm:$0xff] %vm245_vm1, %v968_v0  ;;  %249 = vst.msk [vmem:[%s1133_s27 + $0x18] sm:$0xff] %vm245_vm1, %v968_v0  ;;  %s499_s6 = scalar_lea.sflag [#allocation9], %s1110_s8  ;;  %s848_s7 = scalar_lea.vmem %s531_s30, 16 }
  0x45   : > { %693 = vmatpush3.msra.mxu0 %v254_v3  ;;  %p849_p1 = scmp.ne.s32.totalorder %s531_s30, %s848_s7  ;;  %s971_s10 = smov [#allocation8]  }
  0x46   : > { %694 = vmatprep.subr.mxu0 %v968_v0  ;;  %s852_s25 = sshll.u32 %s971_s10, 4  ;;  %s853_s25 = int_to_ptr.vmem [resolvable:$false] %s852_s25 }
  0x47   : > { %695 = vmatpush3.msra.mxu0 %v253_v4  ;;  %p850_p8 = pnand %p849_p1, %p1082_p13  ;;  %s854_s11 = scalar_lea.vmem %s853_s25, 32 }
  0x48   : > { %697 = vmatmul.mubr.msk.f32.vlgmr.msra.gmra.mxu0 %vm245_vm1, %v252_v5  ;;  %v482_v18 = vld [vmem:[%s1124_s20] sm:$0x1]  ;;  %p855_p0 = scmp.lt.s32.totalorder %s531_s30, %s853_s25  ;;  %p856_p2 = scmp.lt.s32.totalorder %s854_s11, %s848_s7 }
  0x49   : > { %p851_p10 = pneg %p850_p8 }
  0x4a   : > { %p857_p3 = por %p856_p2, %p855_p0 }
  0x4c   : > { %p858_p5 = pnand %p857_p3, %p851_p10 }
 0x108   : > { %v327_v6 = vpop.f32.mrf.mxu0 }
 0x109   : > { %v333_v7 = vmul.f32 1.442695, %v327_v6  ;;  %373 = vrot.lane.b32.xlu0 %v327_v6, %s970_s22  ;;  %v332_v9 = vadd.f32 1.0, %v327_v6  ;;  %vm331_vm3 = vcmp.gt.f32.partialorder %v327_v6, 0.0 }
 0x10a   : > { %v698_v8 = vpop.f32.mrf.mxu0 }
 0x10b   : > { %792 = vpow2.f32 %v333_v7 }
 0x118   : > { %v793_v10 = vpop.eup %792 }
 0x119   : > { %v335_v11 = vsel %vm331_vm3, %v332_v9, %v793_v10 }
 0x11a   : > { %v483_v12 = vsel %vm245_vm1, %v335_v11, 0.0 }
 0x11b   : > { %v484_v13 = vrot.slane %v483_v12, 4 }
 0x11d   : > { %v485_v14 = vadd.f32 %v484_v13, %v483_v12 }
 0x11f   : > { %v486_v15 = vrot.slane %v485_v14, 2 }
 0x121   : > { %v487_v16 = vadd.f32 %v486_v15, %v485_v14 }
 0x123   : > { %v488_v17 = vrot.slane %v487_v16, 1 }
 0x125   : > { %v489_v19 = vadd.f32 %v488_v17, %v487_v16 }
 0x127   : > { %340 = vxpose.xlu0.b32.start.end [1/1] (short) (narrow) %v335_v11, 32  ;;  %v490_v20 = vadd.f32 %v489_v19, %v482_v18 }
 0x129   : > { %492 = vst.msk [vmem:[%s1124_s20] sm:$0x1] %vm250_vm2, %v490_v20 }
 0x17b   : > { %v374_v21 = vpop.permute.xlu0 %373 }
 0x17c   : > { %699 = vmatprep.subr.mxu1 %v374_v21 }
 0x17d   : > { %700 = vmatpush3.msra.mxu1 %v374_v21 }
 0x1a3   : > { %v356_v22 = vpop.trf.xlu0 }
 0x1a4   : > { %701 = vmatprep.mubr.msk.f32.mxu1 %vm376_vm4, %v356_v22 }
 0x1a7   : > { %v357_v23 = vpop.trf.xlu0 }
 0x1a8   : > { %702 = vmatmul.mubr.msk.f32.vlgmr.msra.gmra.mxu1 %vm376_vm4, %v357_v23 }
 0x1ab   : > { %v358_v24 = vpop.trf.xlu0 }
 0x1ac   : > { %704 = vmatprep.mubr.msk.f32.mxu1 %vm376_vm4, %v358_v24 }
 0x1af   : > { %v359_v25 = vpop.trf.xlu0 }
 0x1b0   : > { %705 = vmatmul.mubr.msk.f32.gmra.mxu1 %vm376_vm4, %v359_v25 }
 0x1b1   : > { %861 = shalt.err (!%p858_p5)
}
 0x1b2   : > { %s862_s18 = scalar_lea.hbm %s528_s5, 16  ;;  %s866_s22 = scalar_lea.hbm %s1231_s3, 32 }
 0x1b3   : > { %p863_p7 = scmp.ne.s32.totalorder %s528_s5, %s862_s18  ;;  %p867_p9 = scmp.lt.s32.totalorder %s528_s5, %s1231_s3 }
 0x1b4   : > { %p868_p11 = scmp.lt.s32.totalorder %s866_s22, %s862_s18 }
 0x1b5   : > { %p864_p6 = pnand %p863_p7, %p1082_p13 }
 0x1b6   : > { %p869_p12 = por %p868_p11, %p867_p9 }
 0x1b7   : > { %p865_p4 = pneg %p864_p6 }
 0x1b9   : > { %p870_p1 = pnand %p869_p12, %p865_p4 }
 0x1bb   : > { %873 = shalt.err (!%p870_p1)
}
 0x1bc   : > { %714 = dma.vmem_to_hbm [thread:$0]  (%p1082_p13), %s531_s30, 16, %s528_s5, %s499_s6   ;;  %v337_v26 = vld [vmem:[%s1133_s27 + $0x8] sm:$0xff]  ;;  %v336_v28 = vld [vmem:[%s1133_s27] sm:$0xff]  ;;  %v339_v32 = vld [vmem:[%s1133_s27 + $0x18] sm:$0xff] }
 0x1bd   : > { %s677_s4 = sshll.u32 %s954_s15, 9  ;;  %s513_s21 = sshll.u32 %s1133_s27, 4  ;;  %v338_v34 = vld [vmem:[%s1133_s27 + $0x10] sm:$0xff]  ;;  %s1176_s21 = int_to_ptr.vmem [resolvable:$true] %s513_s21 }
 0x1be   : > { %s1174_s6 = scalar_lea.hbm %s1230_s2, %s677_s4  ;;  %s494_s15 = scalar_lea.sflag [#allocation4], %s1110_s8 }
 0x1bf   : > { %s874_s7 = scalar_lea.vmem %s1176_s21, 512  ;;  %s972_s10 = smov [#allocation7]  }
 0x1c0   : > { %p875_p8 = scmp.ne.s32.totalorder %s1176_s21, %s874_s7  ;;  %s878_s25 = sshll.u32 %s972_s10, 4  ;;  %s879_s25 = int_to_ptr.vmem [resolvable:$false] %s878_s25 }
 0x1c1   : > { %s880_s11 = scalar_lea.vmem %s879_s25, 1024  ;;  %p881_p2 = scmp.lt.s32.totalorder %s1176_s21, %s879_s25 }
 0x1c2   : > { %p876_p10 = pnand %p875_p8, %p1082_p13  ;;  %p882_p3 = scmp.lt.s32.totalorder %s880_s11, %s874_s7 }
 0x1c4   : > { %p877_p0 = pneg %p876_p10  ;;  %p883_p5 = por %p882_p3, %p881_p2 }
 0x1c6   : > { %p884_p7 = pnand %p883_p5, %p877_p0 }
 0x268   : > { %v703_v27 = vpop.f32.mrf.mxu1 }
 0x269   : > { %v475_v29 = vadd.f32 %v703_v27, %v337_v26 }
 0x26a   : > { %v455_v30 = vpop.f32.mrf.mxu1 }
 0x26b   : > { %479 = vst.msk [vmem:[%s1133_s27 + $0x8] sm:$0xff] %vm245_vm1, %v475_v29  ;;  %v474_v31 = vadd.f32 %v455_v30, %v336_v28 }
 0x26d   : > { %478 = vst.msk [vmem:[%s1133_s27] sm:$0xff] %vm245_vm1, %v474_v31 }
 0x270   : > { %v706_v33 = vpop.f32.mrf.mxu1 }
 0x271   : > { %v477_v35 = vadd.f32 %v706_v33, %v339_v32 }
 0x272   : > { %v465_v36 = vpop.f32.mrf.mxu1 }
 0x273   : > { %481 = vst.msk [vmem:[%s1133_s27 + $0x18] sm:$0xff] %vm245_vm1, %v477_v35  ;;  %v476_v37 = vadd.f32 %v465_v36, %v338_v34 }
 0x275   : > { %480 = vst.msk [vmem:[%s1133_s27 + $0x10] sm:$0xff] %vm245_vm1, %v476_v37 }
 0x276   : > { %887 = shalt.err (!%p884_p7)
}
 0x277   : > { %s888_s27 = scalar_lea.hbm %s1174_s6, 512  ;;  %s892_s20 = scalar_lea.hbm %s1230_s2, 1024 }
 0x278   : > { %p889_p6 = scmp.ne.s32.totalorder %s1174_s6, %s888_s27  ;;  %p893_p11 = scmp.lt.s32.totalorder %s1174_s6, %s1230_s2 }
 0x279   : > { %p894_p12 = scmp.lt.s32.totalorder %s892_s20, %s888_s27 }
 0x27a   : > { %p890_p4 = pnand %p889_p6, %p1082_p13 }
 0x27b   : > { %p895_p1 = por %p894_p12, %p893_p11 }
 0x27c   : > { %p891_p9 = pneg %p890_p4 }
 0x27e   : > { %p896_p8 = pnand %p895_p1, %p891_p9 }
 0x280   : > { %899 = shalt.err (!%p896_p8)
}
 0x281   : > { %s973_s29 = smov 128   ;;  %s974_s4 = smov 8  }
 0x282   : > { %713 = dma.vmem_to_hbm [thread:$0]  (%p1082_p13), %s1176_s21, 512, %s1174_s6, %s494_s15, %s973_s29, %s973_s29, %s974_s4  }
 0x283 PF: > { %s542_s30 = sand.u32 1, %s942_s12   ;;  %p1243_p10 = scmp.ne.s32.totalorder %s1236_s23, 0 }
 0x284   : > { %p1244_p0 = scmp.ge.s32.totalorder %s962_s17, 2  ;;  %s543_s5 = scalar_lea.sflag [#allocation4], %s542_s30 }
 0x286   : > { %p726_p2 = pnand %p1244_p0, %p1243_p10 }
 0x288   : > { %p727_p3 = pneg %p726_p2 }
 0x28a   : > { %933 = dma.done.wait (%p727_p3), %s543_s5, 512  }
 0x28b   : > { %935 = vsyncadd (%p727_p3), %s543_s5, 4294966784  ;;  %s552_s7 = scalar_lea.sflag [#allocation9], %s542_s30 }
 0x28c   : > { %937 = dma.done.wait (%p727_p3), %s552_s7, 16  }
 0x28d   : > { %939 = vsyncadd (%p727_p3), %s552_s7, 4294967280  ;;  %s24_s17 = sadd.s32 1, %s962_s17   ;;  %s1245_s12 = smov %s946_s13 }
 0x28e   : > { %p21_p5 = scmp.ge.s32.totalorder %s24_s17, 4   ;;  %s1246_s13 = smov %s950_s14 }
 0x28f   : > { %s1247_s14 = smov %s1091_s19  ;;  %s1248_s15 = smov %s958_s16 }
 0x290   : > { %s1249_s16 = smov %s1251_s28  ;;  %23 = sbr.rel (!%p21_p5) target bundleno = 9 (0x9), region = 98 }
 0x295   :  { %556 = vsyncpa [#allocation3], 1 }
 0x296   :  { %558 = vsyncpa [#allocation3 + $0x1], 1 }
 0x297   :  { %559 = vsyncpa [#allocation6], 1 }
 0x298   :  { %560 = vsyncpa [#allocation4], 1 }
 0x299   :  { %562 = vsyncpa [#allocation4 + $0x1], 1 }
 0x29a   :  { %563 = vsyncpa [#allocation9], 1 }
 0x29b   :  { %565 = vsyncpa [#allocation9 + $0x1], 1 }

</bundles_post_ra>
